<compile_context>
chip_gen: v6e
topology: v6e:2x2x1
jax: 0.10.0
libtpu: 0.0.40
codegen_flags: <defaults>
</compile_context>

<pallas_src>
import functools

import jax
import jax.numpy as jnp
from jax.experimental import pallas as pl
from jax.experimental.pallas import tpu as pltpu

LANE = 128      # vreg lane width
SUBLANE = 8     # f32 sublane width


def _round_up(x, m):
    return (x + m - 1) // m * m


def actor_kernel(x_ref, w1_ref, b1_ref, w2_ref, b2_ref, w3_ref, b3_ref, o_ref):
    # Fused 3-layer MLP on one batch tile; f32 accumulation on the MXU,
    # ReLU on the VPU, tanh on the EUP.
    x = x_ref[...]
    h1 = jnp.dot(x, w1_ref[...], preferred_element_type=jnp.float32) + b1_ref[...]
    h1 = jnp.maximum(h1, 0.0)                                     # ReLU
    h2 = jnp.dot(h1, w2_ref[...], preferred_element_type=jnp.float32) + b2_ref[...]
    h2 = jnp.maximum(h2, 0.0)                                     # ReLU
    o = jnp.dot(h2, w3_ref[...], preferred_element_type=jnp.float32) + b3_ref[...]
    o_ref[...] = jnp.tanh(o).astype(o_ref.dtype)                  # tanh


def _pick_batch_tile(b):
    """MXU-friendly batch tile: as large as possible, but keep >= 2 grid steps when
    the batch allows it so the parallel grid axis can split across v7x's 2 TCs."""
    b8 = _round_up(b, SUBLANE)
    if b8 <= SUBLANE:
        return SUBLANE
    if b8 <= 512:
        return _round_up(b8 // 2, SUBLANE)   # ~two-step grid
    return 256


def _pad2d(a, rows, cols):
    return jnp.pad(a, ((0, rows - a.shape[0]), (0, cols - a.shape[1])))


@functools.partial(jax.jit, static_argnames=("batch_tile",))
def actor_forward(x, params, *, batch_tile=None):
    """x: (B, n_state) f32. params: dict of (in,out) weights and (1,out) biases at
    their logical (unpadded) shapes."""
    B, n_state = x.shape
    w1, b1 = params["w1"], params["b1"]
    w2, b2 = params["w2"], params["b2"]
    w3, b3 = params["w3"], params["b3"]
    hidden1 = w1.shape[1]
    hidden2 = w2.shape[1]
    n_action = w3.shape[1]

    if batch_tile is None:
        batch_tile = _pick_batch_tile(B)

    # Lane-dense padding: feature dims -> multiples of 128; batch -> tile multiple.
    ns_p = _round_up(n_state, LANE)
    h1_p = _round_up(hidden1, LANE)
    h2_p = _round_up(hidden2, LANE)
    na_p = _round_up(n_action, LANE)
    b_p = _round_up(B, batch_tile)

    xp = _pad2d(x.astype(jnp.float32), b_p, ns_p)
    # For a long-lived deployment, pad the parameters once at init; doing it here
    # keeps the wrapper drop-in and the tiny pads fuse under jit.
    # TODO(synk): optional bf16 weight storage for v6e/v7x MXU (keep f32 accumulate).
    w1p, b1p = _pad2d(w1, ns_p, h1_p), _pad2d(b1, 1, h1_p)
    w2p, b2p = _pad2d(w2, h1_p, h2_p), _pad2d(b2, 1, h2_p)
    w3p, b3p = _pad2d(w3, h2_p, na_p), _pad2d(b3, 1, na_p)

    grid = (b_p // batch_tile,)

    # Weights/biases: whole array resident in VMEM, single copy (no double-buffer).
    resident = pl.BlockSpec(memory_space=pltpu.MemorySpace.VMEM)

    cost = pl.CostEstimate(
        flops=2 * b_p * (ns_p * h1_p + h1_p * h2_p + h2_p * na_p),
        transcendentals=b_p * na_p,
        bytes_accessed=4 * (xp.size + b_p * na_p + w1p.size + w2p.size + w3p.size
                            + b1p.size + b2p.size + b3p.size),
    )

    out_p = pl.pallas_call(
        actor_kernel,
        out_shape=jax.ShapeDtypeStruct((b_p, na_p), jnp.float32),
        grid=grid,
        in_specs=[
            pl.BlockSpec((batch_tile, ns_p), lambda i: (i, 0)),   # x batch tile
            resident, resident,                                   # fc1 W, b
            resident, resident,                                   # fc2 W, b
            resident, resident,                                   # out W, b
        ],
        out_specs=pl.BlockSpec((batch_tile, na_p), lambda i: (i, 0)),
        compiler_params=pltpu.CompilerParams(
            dimension_semantics=("parallel",)),
        cost_estimate=cost,
    )(xp, w1p, b1p, w2p, b2p, w3p, b3p)

    return out_p[:B, :n_action]


def init_actor_params(key, n_state, n_action, hidden1, hidden2):
    """Deterministic init mirroring Actor.reset_params():
    fc1/fc2 weights ~ U(-1/sqrt(fan), 1/sqrt(fan)); out weights ~ U(-eps, eps).
    (hidden_init in the reference uses weight.size()[0] == out_features.)
    Biases use PyTorch's default Linear init: U(-1/sqrt(in_features), ...)."""
    ks = jax.random.split(key, 6)
    eps = 0.003
    lim1 = 1.0 / jnp.sqrt(jnp.float32(hidden1))
    lim2 = 1.0 / jnp.sqrt(jnp.float32(hidden2))
    blim1 = 1.0 / jnp.sqrt(jnp.float32(n_state))
    blim2 = 1.0 / jnp.sqrt(jnp.float32(hidden1))
    blim3 = 1.0 / jnp.sqrt(jnp.float32(hidden2))
    # Weights stored as (in_features, out_features) for x @ W.
    w1 = jax.random.uniform(ks[0], (n_state, hidden1), jnp.float32, -lim1, lim1)
    w2 = jax.random.uniform(ks[1], (hidden1, hidden2), jnp.float32, -lim2, lim2)
    w3 = jax.random.uniform(ks[2], (hidden2, n_action), jnp.float32, -eps, eps)
    b1 = jax.random.uniform(ks[3], (1, hidden1), jnp.float32, -blim1, blim1)
    b2 = jax.random.uniform(ks[4], (1, hidden2), jnp.float32, -blim2, blim2)
    b3 = jax.random.uniform(ks[5], (1, n_action), jnp.float32, -blim3, blim3)
    return {"w1": w1, "b1": b1, "w2": w2, "b2": b2, "w3": w3, "b3": b3}


def actor_forward_ref(x, p):
    h1 = jnp.maximum(x @ p["w1"] + p["b1"], 0.0)
    h2 = jnp.maximum(h1 @ p["w2"] + p["b2"], 0.0)
    return jnp.tanh(h2 @ p["w3"] + p["b3"])


if __name__ == "__main__":
    key = jax.random.PRNGKey(0)
    kx, kx2, kp = jax.random.split(key, 3)

    n_state, n_action, hidden1, hidden2 = 8, 4, 32, 32
    params = init_actor_params(kp, n_state, n_action, hidden1, hidden2)

    ok = True
    # (a) tiny batch (single-step grid), (b) batch exercising row padding + a
    # multi-step "parallel" grid (2 tiles of 104 rows).
    for kk, batch in ((kx, 8), (kx2, 200)):
        x = jax.random.normal(kk, (batch, n_state), jnp.float32)
        out = jax.block_until_ready(actor_forward(x, params))
        ref = actor_forward_ref(x, params)
        ok = ok and (out.shape == (batch, n_action))
        ok = ok and bool(jnp.allclose(out, ref, atol=1e-5, rtol=1e-5))
    assert ok, "mismatch vs JAX reference"
    print("KERNEL_OK")
</pallas_src>

<mosaic_0001>
module attributes {stable_mosaic.version = 11 : i64} {
  func.func @actor_kernel(%arg0: i32, %arg1: memref<8x128xf32, #tpu.memory_space<vmem>>, %arg2: memref<128x128xf32, #tpu.memory_space<vmem>>, %arg3: memref<1x128xf32, #tpu.memory_space<vmem>>, %arg4: memref<128x128xf32, #tpu.memory_space<vmem>>, %arg5: memref<1x128xf32, #tpu.memory_space<vmem>>, %arg6: memref<128x128xf32, #tpu.memory_space<vmem>>, %arg7: memref<1x128xf32, #tpu.memory_space<vmem>>, %arg8: memref<8x128xf32, #tpu.memory_space<vmem>>) attributes {dimension_semantics = [#tpu.dimension_semantics<parallel>], iteration_bounds = array<i64: 1>, scalar_prefetch = 0 : i64, scratch_operands = 0 : i64, tpu.core_type = #tpu.core_type<tc>, window_params = [{transform_indices = @transform_0, window_bounds = array<i64: 8, 128>}, {pipeline_mode = #tpu.pipeline_mode<synchronous>, transform_indices = @transform_1, window_bounds = array<i64: 128, 128>}, {pipeline_mode = #tpu.pipeline_mode<synchronous>, transform_indices = @transform_2, window_bounds = array<i64: 1, 128>}, {pipeline_mode = #tpu.pipeline_mode<synchronous>, transform_indices = @transform_3, window_bounds = array<i64: 128, 128>}, {pipeline_mode = #tpu.pipeline_mode<synchronous>, transform_indices = @transform_4, window_bounds = array<i64: 1, 128>}, {pipeline_mode = #tpu.pipeline_mode<synchronous>, transform_indices = @transform_5, window_bounds = array<i64: 128, 128>}, {pipeline_mode = #tpu.pipeline_mode<synchronous>, transform_indices = @transform_6, window_bounds = array<i64: 1, 128>}, {transform_indices = @transform_7, window_bounds = array<i64: 8, 128>}]} {
    %c0 = arith.constant 0 : index
    %c0_0 = arith.constant 0 : index
    %0 = vector.load %arg1[%c0, %c0_0] : memref<8x128xf32, #tpu.memory_space<vmem>>, vector<8x128xf32>
    %c0_1 = arith.constant 0 : index
    %c0_2 = arith.constant 0 : index
    %1 = vector.load %arg2[%c0_1, %c0_2] : memref<128x128xf32, #tpu.memory_space<vmem>>, vector<128x128xf32>
    %cst = arith.constant dense<0.000000e+00> : vector<8x128xf32>
    %2 = tpu.matmul %0, %1, %cst {dimension_numbers = #tpu.dot_dimension_numbers<[1], [0], [0], [1], [0, 0, 1, 1], [], []>} : vector<8x128xf32>, vector<128x128xf32>, vector<8x128xf32> -> vector<8x128xf32>
    %c0_3 = arith.constant 0 : index
    %c0_4 = arith.constant 0 : index
    %3 = vector.load %arg3[%c0_3, %c0_4] : memref<1x128xf32, #tpu.memory_space<vmem>>, vector<1x128xf32>
    %4 = vector.broadcast %3 : vector<1x128xf32> to vector<8x128xf32>
    %5 = arith.addf %2, %4 : vector<8x128xf32>
    %cst_5 = arith.constant 0.000000e+00 : f32
    %6 = vector.broadcast %cst_5 : f32 to vector<8x128xf32>
    %7 = arith.maximumf %5, %6 : vector<8x128xf32>
    %c0_6 = arith.constant 0 : index
    %c0_7 = arith.constant 0 : index
    %8 = vector.load %arg4[%c0_6, %c0_7] : memref<128x128xf32, #tpu.memory_space<vmem>>, vector<128x128xf32>
    %cst_8 = arith.constant dense<0.000000e+00> : vector<8x128xf32>
    %9 = tpu.matmul %7, %8, %cst_8 {dimension_numbers = #tpu.dot_dimension_numbers<[1], [0], [0], [1], [0, 0, 1, 1], [], []>} : vector<8x128xf32>, vector<128x128xf32>, vector<8x128xf32> -> vector<8x128xf32>
    %c0_9 = arith.constant 0 : index
    %c0_10 = arith.constant 0 : index
    %10 = vector.load %arg5[%c0_9, %c0_10] : memref<1x128xf32, #tpu.memory_space<vmem>>, vector<1x128xf32>
    %11 = vector.broadcast %10 : vector<1x128xf32> to vector<8x128xf32>
    %12 = arith.addf %9, %11 : vector<8x128xf32>
    %cst_11 = arith.constant 0.000000e+00 : f32
    %13 = vector.broadcast %cst_11 : f32 to vector<8x128xf32>
    %14 = arith.maximumf %12, %13 : vector<8x128xf32>
    %c0_12 = arith.constant 0 : index
    %c0_13 = arith.constant 0 : index
    %15 = vector.load %arg6[%c0_12, %c0_13] : memref<128x128xf32, #tpu.memory_space<vmem>>, vector<128x128xf32>
    %cst_14 = arith.constant dense<0.000000e+00> : vector<8x128xf32>
    %16 = tpu.matmul %14, %15, %cst_14 {dimension_numbers = #tpu.dot_dimension_numbers<[1], [0], [0], [1], [0, 0, 1, 1], [], []>} : vector<8x128xf32>, vector<128x128xf32>, vector<8x128xf32> -> vector<8x128xf32>
    %c0_15 = arith.constant 0 : index
    %c0_16 = arith.constant 0 : index
    %17 = vector.load %arg7[%c0_15, %c0_16] : memref<1x128xf32, #tpu.memory_space<vmem>>, vector<1x128xf32>
    %18 = vector.broadcast %17 : vector<1x128xf32> to vector<8x128xf32>
    %19 = arith.addf %16, %18 : vector<8x128xf32>
    %20 = math.tanh %19 : vector<8x128xf32>
    %c0_17 = arith.constant 0 : index
    %c0_18 = arith.constant 0 : index
    %21 = vector.load %arg8[%c0_17, %c0_18] : memref<8x128xf32, #tpu.memory_space<vmem>>, vector<8x128xf32>
    tpu.vector_store %arg8[%c0_17, %c0_18], %20 {strides = array<i32>} : memref<8x128xf32, #tpu.memory_space<vmem>>, vector<8x128xf32>,
    return
  }
  func.func @transform_0(%arg0: i32) -> (i32, i32) {
    %c0_i32 = arith.constant 0 : i32
    %c0_i32_0 = arith.constant 0 : i32
    return %arg0, %c0_i32 : i32, i32
  }
  func.func @transform_1(%arg0: i32) -> (i32, i32) {
    %c0_i32 = arith.constant 0 : i32
    %c0_i32_0 = arith.constant 0 : i32
    %c0_i32_1 = arith.constant 0 : i32
    return %c0_i32, %c0_i32_0 : i32, i32
  }
  func.func @transform_2(%arg0: i32) -> (i32, i32) {
    %c0_i32 = arith.constant 0 : i32
    %c0_i32_0 = arith.constant 0 : i32
    %c0_i32_1 = arith.constant 0 : i32
    return %c0_i32, %c0_i32_0 : i32, i32
  }
  func.func @transform_3(%arg0: i32) -> (i32, i32) {
    %c0_i32 = arith.constant 0 : i32
    %c0_i32_0 = arith.constant 0 : i32
    %c0_i32_1 = arith.constant 0 : i32
    return %c0_i32, %c0_i32_0 : i32, i32
  }
  func.func @transform_4(%arg0: i32) -> (i32, i32) {
    %c0_i32 = arith.constant 0 : i32
    %c0_i32_0 = arith.constant 0 : i32
    %c0_i32_1 = arith.constant 0 : i32
    return %c0_i32, %c0_i32_0 : i32, i32
  }
  func.func @transform_5(%arg0: i32) -> (i32, i32) {
    %c0_i32 = arith.constant 0 : i32
    %c0_i32_0 = arith.constant 0 : i32
    %c0_i32_1 = arith.constant 0 : i32
    return %c0_i32, %c0_i32_0 : i32, i32
  }
  func.func @transform_6(%arg0: i32) -> (i32, i32) {
    %c0_i32 = arith.constant 0 : i32
    %c0_i32_0 = arith.constant 0 : i32
    %c0_i32_1 = arith.constant 0 : i32
    return %c0_i32, %c0_i32_0 : i32, i32
  }
  func.func @transform_7(%arg0: i32) -> (i32, i32) {
    %c0_i32 = arith.constant 0 : i32
    %c0_i32_0 = arith.constant 0 : i32
    return %arg0, %c0_i32 : i32, i32
  }
}

</mosaic_0001>

<bundles_post_ra>
// kernel: actor_forward.1
= control target key start
LH: loop header
LB: loop body
LE: loop exit
PB: predicated region body
PF: predicated region fallthrough
CT: control target
= control target key end

     0   :  { %v477_v0 = vmov 0.0   ;;  %vm478_vm0 = vmmov 0   ;;  %s732_s1 = inlined_call_operand.vmem [shape: f32[128,128], index: 1, kind: input, shape index: {}]   ;;  %s733_s3 = inlined_call_operand.vmem [shape: f32[128,128], index: 3, kind: input, shape index: {}]   ;;  %s734_s0 = inlined_call_operand.vmem [shape: f32[8,128], index: 0, kind: input, shape index: {}]   ;;  %s735_s5 = inlined_call_operand.vmem [shape: f32[128,128], index: 5, kind: input, shape index: {}]   ;;  %s736_s2 = inlined_call_operand.vmem [shape: f32[1,128], index: 2, kind: input, shape index: {}]   ;;  %s737_s4 = inlined_call_operand.vmem [shape: f32[1,128], index: 4, kind: input, shape index: {}]   ;;  %s738_s6 = inlined_call_operand.vmem [shape: f32[1,128], index: 6, kind: input, shape index: {}]   ;;  %s739_s7 = inlined_call_operand.vmem [shape: f32[8,128], index: 7, kind: output, shape index: {}]  }
   0x1   :  { %368 = vmatprep.subr.mxu0 %v477_v0  ;;  %v42_v1 = vld [vmem:[%s732_s1 + $0x78] sm:$0xff]  ;;  %v41_v2 = vld [vmem:[%s732_s1 + $0x70] sm:$0xff]  ;;  %400 = vmatprep.mubr.msk.f32.mxu0 %vm478_vm0, %v477_v0  ;;  %v40_v3 = vld [vmem:[%s732_s1 + $0x68] sm:$0xff] }
   0x2   :  { %369 = vmatpush3.msra.mxu0 %v42_v1  ;;  %403 = vmatprep.subr.mxu1 %v477_v0  ;;  %v39_v4 = vld [vmem:[%s732_s1 + $0x60] sm:$0xff]  ;;  %v136_v5 = vld [vmem:[%s733_s3 + $0x78] sm:$0xff]  ;;  %v135_v7 = vld [vmem:[%s733_s3 + $0x70] sm:$0xff] }
   0x3   :  { %370 = vmatprep.subr.mxu0 %v477_v0  ;;  %435 = vmatprep.mubr.msk.f32.mxu1 %vm478_vm0, %v477_v0  ;;  %v38_v6 = vld [vmem:[%s732_s1 + $0x58] sm:$0xff]  ;;  %v134_v8 = vld [vmem:[%s733_s3 + $0x68] sm:$0xff]  ;;  %v37_v9 = vld [vmem:[%s732_s1 + $0x50] sm:$0xff] }
   0x4   :  { %371 = vmatpush3.msra.mxu0 %v41_v2  ;;  %404 = vmatpush3.msra.mxu1 %v136_v5  ;;  %v133_v10 = vld [vmem:[%s733_s3 + $0x60] sm:$0xff]  ;;  %v36_v11 = vld [vmem:[%s732_s1 + $0x48] sm:$0xff]  ;;  %v132_v12 = vld [vmem:[%s733_s3 + $0x58] sm:$0xff] }
   0x5   :  { %372 = vmatprep.subr.mxu0 %v477_v0  ;;  %405 = vmatprep.subr.mxu1 %v477_v0  ;;  %v35_v13 = vld [vmem:[%s732_s1 + $0x40] sm:$0xff]  ;;  %v131_v14 = vld [vmem:[%s733_s3 + $0x50] sm:$0xff]  ;;  %v34_v15 = vld [vmem:[%s732_s1 + $0x38] sm:$0xff] }
   0x6   :  { %373 = vmatpush3.msra.mxu0 %v40_v3  ;;  %406 = vmatpush3.msra.mxu1 %v135_v7  ;;  %v130_v16 = vld [vmem:[%s733_s3 + $0x48] sm:$0xff]  ;;  %v33_v17 = vld [vmem:[%s732_s1 + $0x30] sm:$0xff]  ;;  %v129_v18 = vld [vmem:[%s733_s3 + $0x40] sm:$0xff] }
   0x7   :  { %374 = vmatprep.subr.mxu0 %v477_v0  ;;  %407 = vmatprep.subr.mxu1 %v477_v0  ;;  %v32_v19 = vld [vmem:[%s732_s1 + $0x28] sm:$0xff]  ;;  %v128_v20 = vld [vmem:[%s733_s3 + $0x38] sm:$0xff]  ;;  %v31_v21 = vld [vmem:[%s732_s1 + $0x20] sm:$0xff] }
   0x8   :  { %375 = vmatpush3.msra.mxu0 %v39_v4  ;;  %408 = vmatpush3.msra.mxu1 %v134_v8  ;;  %v127_v22 = vld [vmem:[%s733_s3 + $0x30] sm:$0xff]  ;;  %v30_v23 = vld [vmem:[%s732_s1 + $0x18] sm:$0xff]  ;;  %v126_v24 = vld [vmem:[%s733_s3 + $0x28] sm:$0xff] }
   0x9   :  { %376 = vmatprep.subr.mxu0 %v477_v0  ;;  %409 = vmatprep.subr.mxu1 %v477_v0  ;;  %v29_v25 = vld [vmem:[%s732_s1 + $0x10] sm:$0xff]  ;;  %v125_v26 = vld [vmem:[%s733_s3 + $0x20] sm:$0xff]  ;;  %v28_v27 = vld [vmem:[%s732_s1 + $0x8] sm:$0xff] }
   0xa   :  { %377 = vmatpush3.msra.mxu0 %v38_v6  ;;  %410 = vmatpush3.msra.mxu1 %v133_v10  ;;  %v124_v28 = vld [vmem:[%s733_s3 + $0x18] sm:$0xff]  ;;  %v27_v29 = vld [vmem:[%s732_s1] sm:$0xff]  ;;  %v123_v31 = vld [vmem:[%s733_s3 + $0x10] sm:$0xff] }
   0xb   :  { %378 = vmatprep.subr.mxu0 %v477_v0  ;;  %411 = vmatprep.subr.mxu1 %v477_v0  ;;  %v26_v30 = vld [vmem:[%s734_s0] sm:$0xff]  ;;  %v122_v32 = vld [vmem:[%s733_s3 + $0x8] sm:$0xff]  ;;  %v230_v34 = vld [vmem:[%s735_s5 + $0x78] sm:$0xff] }
   0xc   :  { %379 = vmatpush3.msra.mxu0 %v37_v9  ;;  %412 = vmatpush3.msra.mxu1 %v132_v12  ;;  %v121_v33 = vld [vmem:[%s733_s3] sm:$0xff]  ;;  %v229_v35 = vld [vmem:[%s735_s5 + $0x70] sm:$0xff]  ;;  %v228_v36 = vld [vmem:[%s735_s5 + $0x68] sm:$0xff] }
   0xd   :  { %380 = vmatprep.subr.mxu0 %v477_v0  ;;  %413 = vmatprep.subr.mxu1 %v477_v0  ;;  %v227_v37 = vld [vmem:[%s735_s5 + $0x60] sm:$0xff]  ;;  %v226_v38 = vld [vmem:[%s735_s5 + $0x58] sm:$0xff]  ;;  %v225_v39 = vld [vmem:[%s735_s5 + $0x50] sm:$0xff] }
   0xe   :  { %381 = vmatpush3.msra.mxu0 %v36_v11  ;;  %414 = vmatpush3.msra.mxu1 %v131_v14  ;;  %v224_v40 = vld [vmem:[%s735_s5 + $0x48] sm:$0xff]  ;;  %v223_v41 = vld [vmem:[%s735_s5 + $0x40] sm:$0xff]  ;;  %v222_v42 = vld [vmem:[%s735_s5 + $0x38] sm:$0xff] }
   0xf   :  { %382 = vmatprep.subr.mxu0 %v477_v0  ;;  %415 = vmatprep.subr.mxu1 %v477_v0  ;;  %v221_v43 = vld [vmem:[%s735_s5 + $0x30] sm:$0xff]  ;;  %v220_v44 = vld [vmem:[%s735_s5 + $0x28] sm:$0xff]  ;;  %v219_v45 = vld [vmem:[%s735_s5 + $0x20] sm:$0xff] }
  0x10   :  { %383 = vmatpush3.msra.mxu0 %v35_v13  ;;  %416 = vmatpush3.msra.mxu1 %v130_v16  ;;  %v218_v46 = vld [vmem:[%s735_s5 + $0x18] sm:$0xff]  ;;  %v314_v47 = vld [vmem:[%s736_s2] ss:$0 sm:$0xff]  ;;  %v217_v52 = vld [vmem:[%s735_s5 + $0x10] sm:$0xff] }
  0x11   :  { %384 = vmatprep.subr.mxu0 %v477_v0  ;;  %417 = vmatprep.subr.mxu1 %v477_v0  ;;  %v216_v53 = vld [vmem:[%s735_s5 + $0x8] sm:$0xff]  ;;  %v215_v54 = vld [vmem:[%s735_s5] sm:$0xff] }
  0x12   :  { %385 = vmatpush3.msra.mxu0 %v34_v15  ;;  %418 = vmatpush3.msra.mxu1 %v129_v18  ;;  %v315_v55 = vld [vmem:[%s737_s4] ss:$0 sm:$0xff] }
  0x13   :  { %386 = vmatprep.subr.mxu0 %v477_v0  ;;  %419 = vmatprep.subr.mxu1 %v477_v0  ;;  %v316_v60 = vld [vmem:[%s738_s6] ss:$0 sm:$0xff] }
  0x14   :  { %387 = vmatpush3.msra.mxu0 %v33_v17  ;;  %420 = vmatpush3.msra.mxu1 %v128_v20 }
  0x15   :  { %388 = vmatprep.subr.mxu0 %v477_v0  ;;  %421 = vmatprep.subr.mxu1 %v477_v0 }
  0x16   :  { %389 = vmatpush3.msra.mxu0 %v32_v19  ;;  %422 = vmatpush3.msra.mxu1 %v127_v22 }
  0x17   :  { %390 = vmatprep.subr.mxu0 %v477_v0  ;;  %423 = vmatprep.subr.mxu1 %v477_v0 }
  0x18   :  { %391 = vmatpush3.msra.mxu0 %v31_v21  ;;  %424 = vmatpush3.msra.mxu1 %v126_v24 }
  0x19   :  { %392 = vmatprep.subr.mxu0 %v477_v0  ;;  %425 = vmatprep.subr.mxu1 %v477_v0 }
  0x1a   :  { %393 = vmatpush3.msra.mxu0 %v30_v23  ;;  %426 = vmatpush3.msra.mxu1 %v125_v26 }
  0x1b   :  { %394 = vmatprep.subr.mxu0 %v477_v0  ;;  %427 = vmatprep.subr.mxu1 %v477_v0 }
  0x1c   :  { %395 = vmatpush3.msra.mxu0 %v29_v25  ;;  %428 = vmatpush3.msra.mxu1 %v124_v28 }
  0x1d   :  { %396 = vmatprep.subr.mxu0 %v477_v0  ;;  %429 = vmatprep.subr.mxu1 %v477_v0 }
  0x1e   :  { %397 = vmatpush3.msra.mxu0 %v28_v27  ;;  %430 = vmatpush3.msra.mxu1 %v123_v31 }
  0x1f   :  { %398 = vmatprep.subr.mxu0 %v477_v0  ;;  %431 = vmatprep.subr.mxu1 %v477_v0 }
  0x20   :  { %399 = vmatpush3.msra.mxu0 %v27_v29  ;;  %432 = vmatpush3.msra.mxu1 %v122_v32 }
  0x21   :  { %401 = vmatmul.mubr.f32.vlgmr.msra.gmra.mxu0 %v26_v30  ;;  %438 = vmatprep.subr.mxu0 %v477_v0 }
  0x22   :  { %470 = vmatprep.mubr.msk.f32.mxu0 %vm478_vm0, %v477_v0  ;;  %433 = vmatprep.subr.mxu1 %v477_v0 }
  0x23   :  { %434 = vmatpush3.msra.mxu1 %v121_v33  ;;  %439 = vmatpush3.msra.mxu0 %v230_v34 }
  0x24   :  { %440 = vmatprep.subr.mxu0 %v477_v0 }
  0x25   :  { %441 = vmatpush3.msra.mxu0 %v229_v35 }
  0x26   :  { %442 = vmatprep.subr.mxu0 %v477_v0 }
  0x27   :  { %443 = vmatpush3.msra.mxu0 %v228_v36 }
  0x28   :  { %444 = vmatprep.subr.mxu0 %v477_v0 }
  0x29   :  { %445 = vmatpush3.msra.mxu0 %v227_v37 }
  0x2a   :  { %446 = vmatprep.subr.mxu0 %v477_v0 }
  0x2b   :  { %447 = vmatpush3.msra.mxu0 %v226_v38 }
  0x2c   :  { %448 = vmatprep.subr.mxu0 %v477_v0 }
  0x2d   :  { %449 = vmatpush3.msra.mxu0 %v225_v39 }
  0x2e   :  { %450 = vmatprep.subr.mxu0 %v477_v0 }
  0x2f   :  { %451 = vmatpush3.msra.mxu0 %v224_v40 }
  0x30   :  { %452 = vmatprep.subr.mxu0 %v477_v0 }
  0x31   :  { %453 = vmatpush3.msra.mxu0 %v223_v41 }
  0x32   :  { %454 = vmatprep.subr.mxu0 %v477_v0 }
  0x33   :  { %455 = vmatpush3.msra.mxu0 %v222_v42 }
  0x34   :  { %456 = vmatprep.subr.mxu0 %v477_v0 }
  0x35   :  { %457 = vmatpush3.msra.mxu0 %v221_v43 }
  0x36   :  { %458 = vmatprep.subr.mxu0 %v477_v0 }
  0x37   :  { %459 = vmatpush3.msra.mxu0 %v220_v44 }
  0x38   :  { %460 = vmatprep.subr.mxu0 %v477_v0 }
  0x39   :  { %461 = vmatpush3.msra.mxu0 %v219_v45 }
  0x3a   :  { %462 = vmatprep.subr.mxu0 %v477_v0 }
  0x3b   :  { %463 = vmatpush3.msra.mxu0 %v218_v46 }
  0x3c   :  { %464 = vmatprep.subr.mxu0 %v477_v0 }
  0x3d   :  { %465 = vmatpush3.msra.mxu0 %v217_v52 }
  0x3e   :  { %466 = vmatprep.subr.mxu0 %v477_v0 }
  0x3f   :  { %467 = vmatpush3.msra.mxu0 %v216_v53 }
  0x40   :  { %468 = vmatprep.subr.mxu0 %v477_v0 }
  0x41   :  { %469 = vmatpush3.msra.mxu0 %v215_v54 }
  0xe1   :  { %v116_v48 = vpop.f32.mrf.mxu0 }
  0xe2   :  { %v117_v49 = vadd.f32 %v314_v47, %v116_v48 }
  0xe3   :  { %v402_v50 = vpop.f32.mrf.mxu0 }
  0xe4   :  { %v120_v51 = vmax.f32 %v117_v49, 0.0 }
  0xe6   :  { %436 = vmatmul.mubr.f32.vlgmr.msra.gmra.mxu1 %v120_v51 }
 0x1a6   :  { %v210_v56 = vpop.f32.mrf.mxu1 }
 0x1a7   :  { %v211_v57 = vadd.f32 %v315_v55, %v210_v56 }
 0x1a8   :  { %v437_v58 = vpop.f32.mrf.mxu1 }
 0x1a9   :  { %v214_v59 = vmax.f32 %v211_v57, 0.0 }
 0x1ab   :  { %471 = vmatmul.mubr.f32.vlgmr.msra.gmra.mxu0 %v214_v59 }
 0x26b   :  { %v304_v61 = vpop.f32.mrf.mxu0 }
 0x26c   :  { %v305_v62 = vadd.f32 %v316_v60, %v304_v61 }
 0x26d   :  { %v472_v63 = vpop.f32.mrf.mxu0 }
 0x26e   :  { %475 = vtanh.f32 %v305_v62 }
 0x27b   :  { %v476_v0 = vpop.eup %475 }
 0x27c   :  { %309 = vst [vmem:[%s739_s7] sm:$0xff] %v476_v0 }

</bundles_post_ra>
